<compile_context>
chip_gen: v6e
topology: v6e:2x2x1
jax: 0.10.0
libtpu: 0.0.40
codegen_flags: <defaults>
</compile_context>

<pallas_src>
import jax
import jax.numpy as jnp
from jax.experimental import pallas as pl
from jax.experimental.pallas import tpu as pltpu

HIDDEN = 512  # fixed by the PyTorch module


# ---------------------------------------------------------------------------
# Fused forward kernel: everything lives in VMEM for the duration of the call.
# ---------------------------------------------------------------------------
def _autoencoder_kernel(x_ref, w1_ref, b1_ref, w2_ref, b2_ref,
                        w3_ref, b3_ref, w4_ref, b4_ref, out_ref):
    x = x_ref[...]                                                    # (B, S)
    # encoder: Linear(S, 512) + ReLU, Linear(512, L) + ReLU
    h1 = jnp.maximum(
        jnp.dot(x, w1_ref[...], preferred_element_type=jnp.float32) + b1_ref[...], 0.0)
    z = jnp.maximum(
        jnp.dot(h1, w2_ref[...], preferred_element_type=jnp.float32) + b2_ref[...], 0.0)
    # decoder: Linear(L, 512) + ReLU, Linear(512, S) + Tanh
    h2 = jnp.maximum(
        jnp.dot(z, w3_ref[...], preferred_element_type=jnp.float32) + b3_ref[...], 0.0)
    y = jnp.tanh(
        jnp.dot(h2, w4_ref[...], preferred_element_type=jnp.float32) + b4_ref[...])
    out_ref[...] = y.astype(out_ref.dtype)


def _full_block(shape):
    # Full-array block: exempt from the (8,128) divisibility constraint.
    return pl.BlockSpec(shape, lambda i, _nd=len(shape): (0,) * _nd)


def autoencoder_forward(params, x):
    B, S = x.shape
    L = params["w2"].shape[1]
    args = (x,
            params["w1"], params["b1"],
            params["w2"], params["b2"],
            params["w3"], params["b3"],
            params["w4"], params["b4"])

    flops = 2 * B * (S * HIDDEN + HIDDEN * L + L * HIDDEN + HIDDEN * S)
    bytes_accessed = sum(int(a.size) * a.dtype.itemsize for a in args) + B * S * 4

    return pl.pallas_call(
        _autoencoder_kernel,
        out_shape=jax.ShapeDtypeStruct((B, S), jnp.float32),
        grid=(1,),
        in_specs=[_full_block(a.shape) for a in args],
        out_specs=_full_block((B, S)),
        compiler_params=pltpu.CompilerParams(
            dimension_semantics=("arbitrary",)),
        cost_estimate=pl.CostEstimate(
            flops=flops, transcendentals=B * S, bytes_accessed=bytes_accessed),
    )(*args)


# ---------------------------------------------------------------------------
# Parameters (weights stored pre-transposed as (in, out); biases as (1, out))
# ---------------------------------------------------------------------------
def init_params(key, seq_length, latent_dim):
    def nrm(k, shape, scale=0.05):
        return scale * jax.random.normal(k, shape, dtype=jnp.float32)

    ks = jax.random.split(key, 8)
    return {
        "w1": nrm(ks[0], (seq_length, HIDDEN)), "b1": nrm(ks[1], (1, HIDDEN)),
        "w2": nrm(ks[2], (HIDDEN, latent_dim)), "b2": nrm(ks[3], (1, latent_dim)),
        "w3": nrm(ks[4], (latent_dim, HIDDEN)), "b3": nrm(ks[5], (1, HIDDEN)),
        "w4": nrm(ks[6], (HIDDEN, seq_length)), "b4": nrm(ks[7], (1, seq_length)),
    }


def reference_forward(params, x):
    # Pure-JAX reference with identical math (PyTorch: y = x @ W.T + b, here
    # weights are already stored transposed).
    h1 = jax.nn.relu(x @ params["w1"] + params["b1"])
    z = jax.nn.relu(h1 @ params["w2"] + params["b2"])
    h2 = jax.nn.relu(z @ params["w3"] + params["b3"])
    return jnp.tanh(h2 @ params["w4"] + params["b4"])


# ---------------------------------------------------------------------------
if __name__ == "__main__":
    seq_length = 16
    latent_dim = 8
    batch = 2

    root = jax.random.PRNGKey(0)
    k_param, k_x = jax.random.split(root)

    params = init_params(k_param, seq_length, latent_dim)
    x = jax.random.normal(k_x, (batch, seq_length), dtype=jnp.float32)

    decoded = jax.jit(autoencoder_forward)(params, x)
    jax.block_until_ready(decoded)

    assert decoded.shape == (batch, seq_length)
    ref = reference_forward(params, x)
    assert jnp.allclose(decoded, ref, atol=1e-3, rtol=1e-3), \
        float(jnp.max(jnp.abs(decoded - ref)))
    print("KERNEL_OK")
</pallas_src>

<mosaic_0001>
module attributes {stable_mosaic.version = 11 : i64} {
  func.func @_autoencoder_kernel(%arg0: i32, %arg1: memref<2x16xf32, #tpu.memory_space<vmem>>, %arg2: memref<16x512xf32, #tpu.memory_space<vmem>>, %arg3: memref<1x512xf32, #tpu.memory_space<vmem>>, %arg4: memref<512x8xf32, #tpu.memory_space<vmem>>, %arg5: memref<1x8xf32, #tpu.memory_space<vmem>>, %arg6: memref<8x512xf32, #tpu.memory_space<vmem>>, %arg7: memref<1x512xf32, #tpu.memory_space<vmem>>, %arg8: memref<512x16xf32, #tpu.memory_space<vmem>>, %arg9: memref<1x16xf32, #tpu.memory_space<vmem>>, %arg10: memref<2x16xf32, #tpu.memory_space<vmem>>) attributes {dimension_semantics = [#tpu.dimension_semantics<arbitrary>], iteration_bounds = array<i64: 1>, scalar_prefetch = 0 : i64, scratch_operands = 0 : i64, tpu.core_type = #tpu.core_type<tc>, window_params = [{pipeline_mode = #tpu.pipeline_mode<synchronous>, transform_indices = @transform_0, window_bounds = array<i64: 2, 16>}, {pipeline_mode = #tpu.pipeline_mode<synchronous>, transform_indices = @transform_1, window_bounds = array<i64: 16, 512>}, {pipeline_mode = #tpu.pipeline_mode<synchronous>, transform_indices = @transform_2, window_bounds = array<i64: 1, 512>}, {pipeline_mode = #tpu.pipeline_mode<synchronous>, transform_indices = @transform_3, window_bounds = array<i64: 512, 8>}, {pipeline_mode = #tpu.pipeline_mode<synchronous>, transform_indices = @transform_4, window_bounds = array<i64: 1, 8>}, {pipeline_mode = #tpu.pipeline_mode<synchronous>, transform_indices = @transform_5, window_bounds = array<i64: 8, 512>}, {pipeline_mode = #tpu.pipeline_mode<synchronous>, transform_indices = @transform_6, window_bounds = array<i64: 1, 512>}, {pipeline_mode = #tpu.pipeline_mode<synchronous>, transform_indices = @transform_7, window_bounds = array<i64: 512, 16>}, {pipeline_mode = #tpu.pipeline_mode<synchronous>, transform_indices = @transform_8, window_bounds = array<i64: 1, 16>}, {pipeline_mode = #tpu.pipeline_mode<synchronous>, transform_indices = @transform_9, window_bounds = array<i64: 2, 16>}]} {
    %c0 = arith.constant 0 : index
    %c0_0 = arith.constant 0 : index
    %0 = vector.load %arg1[%c0, %c0_0] : memref<2x16xf32, #tpu.memory_space<vmem>>, vector<2x16xf32>
    %c0_1 = arith.constant 0 : index
    %c0_2 = arith.constant 0 : index
    %1 = vector.load %arg2[%c0_1, %c0_2] : memref<16x512xf32, #tpu.memory_space<vmem>>, vector<16x512xf32>
    %cst = arith.constant dense<0.000000e+00> : vector<2x512xf32>
    %2 = tpu.matmul %0, %1, %cst {dimension_numbers = #tpu.dot_dimension_numbers<[1], [0], [0], [1], [0, 0, 1, 1], [], []>} : vector<2x16xf32>, vector<16x512xf32>, vector<2x512xf32> -> vector<2x512xf32>
    %c0_3 = arith.constant 0 : index
    %c0_4 = arith.constant 0 : index
    %3 = vector.load %arg3[%c0_3, %c0_4] : memref<1x512xf32, #tpu.memory_space<vmem>>, vector<1x512xf32>
    %4 = vector.broadcast %3 : vector<1x512xf32> to vector<2x512xf32>
    %5 = arith.addf %2, %4 : vector<2x512xf32>
    %cst_5 = arith.constant 0.000000e+00 : f32
    %6 = vector.broadcast %cst_5 : f32 to vector<2x512xf32>
    %7 = arith.maximumf %5, %6 : vector<2x512xf32>
    %c0_6 = arith.constant 0 : index
    %c0_7 = arith.constant 0 : index
    %8 = vector.load %arg4[%c0_6, %c0_7] : memref<512x8xf32, #tpu.memory_space<vmem>>, vector<512x8xf32>
    %cst_8 = arith.constant dense<0.000000e+00> : vector<2x8xf32>
    %9 = tpu.matmul %7, %8, %cst_8 {dimension_numbers = #tpu.dot_dimension_numbers<[1], [0], [0], [1], [0, 0, 1, 1], [], []>} : vector<2x512xf32>, vector<512x8xf32>, vector<2x8xf32> -> vector<2x8xf32>
    %c0_9 = arith.constant 0 : index
    %c0_10 = arith.constant 0 : index
    %10 = vector.load %arg5[%c0_9, %c0_10] : memref<1x8xf32, #tpu.memory_space<vmem>>, vector<1x8xf32>
    %11 = vector.broadcast %10 : vector<1x8xf32> to vector<2x8xf32>
    %12 = arith.addf %9, %11 : vector<2x8xf32>
    %cst_11 = arith.constant 0.000000e+00 : f32
    %13 = vector.broadcast %cst_11 : f32 to vector<2x8xf32>
    %14 = arith.maximumf %12, %13 : vector<2x8xf32>
    %c0_12 = arith.constant 0 : index
    %c0_13 = arith.constant 0 : index
    %15 = vector.load %arg6[%c0_12, %c0_13] : memref<8x512xf32, #tpu.memory_space<vmem>>, vector<8x512xf32>
    %cst_14 = arith.constant dense<0.000000e+00> : vector<2x512xf32>
    %16 = tpu.matmul %14, %15, %cst_14 {dimension_numbers = #tpu.dot_dimension_numbers<[1], [0], [0], [1], [0, 0, 1, 1], [], []>} : vector<2x8xf32>, vector<8x512xf32>, vector<2x512xf32> -> vector<2x512xf32>
    %c0_15 = arith.constant 0 : index
    %c0_16 = arith.constant 0 : index
    %17 = vector.load %arg7[%c0_15, %c0_16] : memref<1x512xf32, #tpu.memory_space<vmem>>, vector<1x512xf32>
    %18 = vector.broadcast %17 : vector<1x512xf32> to vector<2x512xf32>
    %19 = arith.addf %16, %18 : vector<2x512xf32>
    %cst_17 = arith.constant 0.000000e+00 : f32
    %20 = vector.broadcast %cst_17 : f32 to vector<2x512xf32>
    %21 = arith.maximumf %19, %20 : vector<2x512xf32>
    %c0_18 = arith.constant 0 : index
    %c0_19 = arith.constant 0 : index
    %22 = vector.load %arg8[%c0_18, %c0_19] : memref<512x16xf32, #tpu.memory_space<vmem>>, vector<512x16xf32>
    %cst_20 = arith.constant dense<0.000000e+00> : vector<2x16xf32>
    %23 = tpu.matmul %21, %22, %cst_20 {dimension_numbers = #tpu.dot_dimension_numbers<[1], [0], [0], [1], [0, 0, 1, 1], [], []>} : vector<2x512xf32>, vector<512x16xf32>, vector<2x16xf32> -> vector<2x16xf32>
    %c0_21 = arith.constant 0 : index
    %c0_22 = arith.constant 0 : index
    %24 = vector.load %arg9[%c0_21, %c0_22] : memref<1x16xf32, #tpu.memory_space<vmem>>, vector<1x16xf32>
    %25 = vector.broadcast %24 : vector<1x16xf32> to vector<2x16xf32>
    %26 = arith.addf %23, %25 : vector<2x16xf32>
    %27 = math.tanh %26 : vector<2x16xf32>
    %c0_23 = arith.constant 0 : index
    %c0_24 = arith.constant 0 : index
    %28 = vector.load %arg10[%c0_23, %c0_24] : memref<2x16xf32, #tpu.memory_space<vmem>>, vector<2x16xf32>
    tpu.vector_store %arg10[%c0_23, %c0_24], %27 {strides = array<i32>} : memref<2x16xf32, #tpu.memory_space<vmem>>, vector<2x16xf32>,
    return
  }
  func.func @transform_0(%arg0: i32) -> (i32, i32) {
    %c0_i32 = arith.constant 0 : i32
    %c0_i32_0 = arith.constant 0 : i32
    %c0_i32_1 = arith.constant 0 : i32
    return %c0_i32, %c0_i32_0 : i32, i32
  }
  func.func @transform_1(%arg0: i32) -> (i32, i32) {
    %c0_i32 = arith.constant 0 : i32
    %c0_i32_0 = arith.constant 0 : i32
    %c0_i32_1 = arith.constant 0 : i32
    return %c0_i32, %c0_i32_0 : i32, i32
  }
  func.func @transform_2(%arg0: i32) -> (i32, i32) {
    %c0_i32 = arith.constant 0 : i32
    %c0_i32_0 = arith.constant 0 : i32
    %c0_i32_1 = arith.constant 0 : i32
    return %c0_i32, %c0_i32_0 : i32, i32
  }
  func.func @transform_3(%arg0: i32) -> (i32, i32) {
    %c0_i32 = arith.constant 0 : i32
    %c0_i32_0 = arith.constant 0 : i32
    %c0_i32_1 = arith.constant 0 : i32
    return %c0_i32, %c0_i32_0 : i32, i32
  }
  func.func @transform_4(%arg0: i32) -> (i32, i32) {
    %c0_i32 = arith.constant 0 : i32
    %c0_i32_0 = arith.constant 0 : i32
    %c0_i32_1 = arith.constant 0 : i32
    return %c0_i32, %c0_i32_0 : i32, i32
  }
  func.func @transform_5(%arg0: i32) -> (i32, i32) {
    %c0_i32 = arith.constant 0 : i32
    %c0_i32_0 = arith.constant 0 : i32
    %c0_i32_1 = arith.constant 0 : i32
    return %c0_i32, %c0_i32_0 : i32, i32
  }
  func.func @transform_6(%arg0: i32) -> (i32, i32) {
    %c0_i32 = arith.constant 0 : i32
    %c0_i32_0 = arith.constant 0 : i32
    %c0_i32_1 = arith.constant 0 : i32
    return %c0_i32, %c0_i32_0 : i32, i32
  }
  func.func @transform_7(%arg0: i32) -> (i32, i32) {
    %c0_i32 = arith.constant 0 : i32
    %c0_i32_0 = arith.constant 0 : i32
    %c0_i32_1 = arith.constant 0 : i32
    return %c0_i32, %c0_i32_0 : i32, i32
  }
  func.func @transform_8(%arg0: i32) -> (i32, i32) {
    %c0_i32 = arith.constant 0 : i32
    %c0_i32_0 = arith.constant 0 : i32
    %c0_i32_1 = arith.constant 0 : i32
    return %c0_i32, %c0_i32_0 : i32, i32
  }
  func.func @transform_9(%arg0: i32) -> (i32, i32) {
    %c0_i32 = arith.constant 0 : i32
    %c0_i32_0 = arith.constant 0 : i32
    %c0_i32_1 = arith.constant 0 : i32
    return %c0_i32, %c0_i32_0 : i32, i32
  }
}

</mosaic_0001>

<bundles_post_ra>
// kernel: autoencoder_forward.1
= control target key start
LH: loop header
LB: loop body
LE: loop exit
PB: predicated region body
PF: predicated region fallthrough
CT: control target
= control target key end

     0   :  { %vm64_vm0 = vcmask 130048   ;;  %v1002_v9 = vmov 0.0   ;;  %s1518_s0 = inlined_call_operand.vmem [shape: f32[2,16], index: 0, kind: input, shape index: {}]   ;;  %s1519_s1 = inlined_call_operand.vmem [shape: f32[16,512], index: 1, kind: input, shape index: {}]   ;;  %s1520_s2 = inlined_call_operand.vmem [shape: f32[1,512], index: 2, kind: input, shape index: {}]   ;;  %s1521_s3 = inlined_call_operand.vmem [shape: f32[512,8], index: 3, kind: input, shape index: {}]   ;;  %s1522_s4 = inlined_call_operand.vmem [shape: f32[1,8], index: 4, kind: input, shape index: {}]   ;;  %s1523_s5 = inlined_call_operand.vmem [shape: f32[8,512], index: 5, kind: input, shape index: {}]   ;;  %s1524_s6 = inlined_call_operand.vmem [shape: f32[1,512], index: 6, kind: input, shape index: {}]   ;;  %s1525_s7 = inlined_call_operand.vmem [shape: f32[512,16], index: 7, kind: input, shape index: {}]   ;;  %s1526_s8 = inlined_call_operand.vmem [shape: f32[1,16], index: 8, kind: input, shape index: {}]   ;;  %s1527_s9 = inlined_call_operand.hbm [shape: f32[2,16], index: 9, kind: output, shape index: {}]  }
   0x1   :  { %v39_v0 = vld [vmem:[%s1519_s1 + $0x28] sm:$0xff]  ;;  %v41_v1 = vld [vmem:[%s1519_s1 + $0x38] sm:$0xff]  ;;  %v38_v2 = vld [vmem:[%s1519_s1 + $0x20] sm:$0xff]  ;;  %132 = vmatprep.mubr.f32.mxu0 %v1002_v9  ;;  %203 = vmatprep.mubr.f32.mxu1 %v1002_v9 }
   0x2   :  { %96 = vmatprep.subr.mxu0 %v39_v0  ;;  %167 = vmatprep.subr.mxu1 %v41_v1  ;;  %v40_v3 = vld [vmem:[%s1519_s1 + $0x30] sm:$0xff]  ;;  %v35_v4 = vld [vmem:[%s1519_s1 + $0x8] sm:$0xff]  ;;  %v37_v5 = vld [vmem:[%s1519_s1 + $0x18] sm:$0xff] }
   0x3   :  { %97 = vmatpush1.msra.mxu0 %v38_v2  ;;  %168 = vmatpush1.msra.mxu1 %v40_v3  ;;  %v34_v6 = vld [vmem:[%s1519_s1] sm:$0xff]  ;;  %v36_v7 = vld [vmem:[%s1519_s1 + $0x10] sm:$0xff]  ;;  %v245_v10 = vld [vmem:[%s1521_s3 + $0xf8] sm:$0xff] }
   0x4   :  { %98 = vmatprep.subr.mxu0 %v35_v4  ;;  %169 = vmatprep.subr.mxu1 %v37_v5  ;;  %v33_v8 = vld [vmem:[%s1518_s0] sm:$0x3]  ;;  %v277_v11 = vld [vmem:[%s1521_s3 + $0x1f8] sm:$0xff]  ;;  %v244_v14 = vld [vmem:[%s1521_s3 + $0xf0] sm:$0xff] }
   0x5   :  { %99 = vmatpush1.msra.mxu0 %v34_v6  ;;  %170 = vmatpush1.msra.mxu1 %v36_v7  ;;  %v229_v12 = vld [vmem:[%s1521_s3 + $0x78] sm:$0xff]  ;;  %v276_v15 = vld [vmem:[%s1521_s3 + $0x1f0] sm:$0xff]  ;;  %v243_v18 = vld [vmem:[%s1521_s3 + $0xe8] sm:$0xff] }
   0x6   :  { %v261_v13 = vld [vmem:[%s1521_s3 + $0x178] sm:$0xff]  ;;  %830 = vmatmul.mubr.msk.f32.vlgmr.msra.gmra.mxu0 %vm64_vm0, %v33_v8  ;;  %831 = vmatmul.mubr.msk.f32.vlgmr.msra.gmra.mxu1 %vm64_vm0, %v33_v8  ;;  %v228_v16 = vld [vmem:[%s1521_s3 + $0x70] sm:$0xff]  ;;  %v275_v19 = vld [vmem:[%s1521_s3 + $0x1e8] sm:$0xff] }
   0x7   :  { %836 = vmatprep.subr.mxu0 %v245_v10  ;;  %871 = vmatprep.subr.mxu1 %v277_v11  ;;  %v260_v17 = vld [vmem:[%s1521_s3 + $0x170] sm:$0xff]  ;;  %v227_v20 = vld [vmem:[%s1521_s3 + $0x68] sm:$0xff]  ;;  %v242_v22 = vld [vmem:[%s1521_s3 + $0xe0] sm:$0xff] }
   0x8   :  { %837 = vmatpush3.msra.mxu0 %v229_v12  ;;  %872 = vmatpush3.msra.mxu1 %v261_v13  ;;  %v259_v21 = vld [vmem:[%s1521_s3 + $0x168] sm:$0xff]  ;;  %v274_v23 = vld [vmem:[%s1521_s3 + $0x1e0] sm:$0xff]  ;;  %v241_v26 = vld [vmem:[%s1521_s3 + $0xd8] sm:$0xff] }
   0x9   :  { %838 = vmatprep.subr.mxu0 %v244_v14  ;;  %873 = vmatprep.subr.mxu1 %v276_v15  ;;  %v226_v24 = vld [vmem:[%s1521_s3 + $0x60] sm:$0xff]  ;;  %v273_v27 = vld [vmem:[%s1521_s3 + $0x1d8] sm:$0xff]  ;;  %v240_v30 = vld [vmem:[%s1521_s3 + $0xd0] sm:$0xff] }
   0xa   :  { %839 = vmatpush3.msra.mxu0 %v228_v16  ;;  %874 = vmatpush3.msra.mxu1 %v260_v17  ;;  %v258_v25 = vld [vmem:[%s1521_s3 + $0x160] sm:$0xff]  ;;  %v225_v28 = vld [vmem:[%s1521_s3 + $0x58] sm:$0xff]  ;;  %v272_v31 = vld [vmem:[%s1521_s3 + $0x1d0] sm:$0xff] }
   0xb   :  { %840 = vmatprep.subr.mxu0 %v243_v18  ;;  %875 = vmatprep.subr.mxu1 %v275_v19  ;;  %v257_v29 = vld [vmem:[%s1521_s3 + $0x158] sm:$0xff]  ;;  %v224_v32 = vld [vmem:[%s1521_s3 + $0x50] sm:$0xff]  ;;  %v239_v34 = vld [vmem:[%s1521_s3 + $0xc8] sm:$0xff] }
   0xc   :  { %841 = vmatpush3.msra.mxu0 %v227_v20  ;;  %876 = vmatpush3.msra.mxu1 %v259_v21  ;;  %v256_v33 = vld [vmem:[%s1521_s3 + $0x150] sm:$0xff]  ;;  %v271_v35 = vld [vmem:[%s1521_s3 + $0x1c8] sm:$0xff]  ;;  %v238_v38 = vld [vmem:[%s1521_s3 + $0xc0] sm:$0xff] }
   0xd   :  { %842 = vmatprep.subr.mxu0 %v242_v22  ;;  %877 = vmatprep.subr.mxu1 %v274_v23  ;;  %v223_v36 = vld [vmem:[%s1521_s3 + $0x48] sm:$0xff]  ;;  %v270_v39 = vld [vmem:[%s1521_s3 + $0x1c0] sm:$0xff] }
   0xe   :  { %843 = vmatpush3.msra.mxu0 %v226_v24  ;;  %878 = vmatpush3.msra.mxu1 %v258_v25  ;;  %v255_v37 = vld [vmem:[%s1521_s3 + $0x148] sm:$0xff]  ;;  %v222_v40 = vld [vmem:[%s1521_s3 + $0x40] sm:$0xff] }
   0xf   :  { %844 = vmatprep.subr.mxu0 %v241_v26  ;;  %879 = vmatprep.subr.mxu1 %v273_v27  ;;  %v254_v41 = vld [vmem:[%s1521_s3 + $0x140] sm:$0xff] }
  0x10   :  { %845 = vmatpush3.msra.mxu0 %v225_v28  ;;  %880 = vmatpush3.msra.mxu1 %v257_v29 }
  0x11   :  { %846 = vmatprep.subr.mxu0 %v240_v30  ;;  %881 = vmatprep.subr.mxu1 %v272_v31 }
  0x12   :  { %847 = vmatpush3.msra.mxu0 %v224_v32  ;;  %882 = vmatpush3.msra.mxu1 %v256_v33 }
  0x13   :  { %848 = vmatprep.subr.mxu0 %v239_v34  ;;  %883 = vmatprep.subr.mxu1 %v271_v35 }
  0x14   :  { %14 = vsyncpa [#allocation3], 0  ;;  %849 = vmatpush3.msra.mxu0 %v223_v36  ;;  %884 = vmatpush3.msra.mxu1 %v255_v37  ;;  %v237_v42 = vld [vmem:[%s1521_s3 + $0xb8] sm:$0xff]  ;;  %v236_v46 = vld [vmem:[%s1521_s3 + $0xb0] sm:$0xff]  ;;  %v44_v11 = vlaneseq  ;;  %vm452_vm1 = vcmask 64512   ;;  %s1003_s22 = smov [#allocation2]  }
  0x15   :  { %v269_v43 = vld [vmem:[%s1521_s3 + $0x1b8] sm:$0xff]  ;;  %850 = vmatprep.subr.mxu0 %v238_v38  ;;  %885 = vmatprep.subr.mxu1 %v270_v39  ;;  %v268_v47 = vld [vmem:[%s1521_s3 + $0x1b0] sm:$0xff]  ;;  %v235_v50 = vld [vmem:[%s1521_s3 + $0xa8] sm:$0xff]  ;;  %s822_s23 = sshll.u32 %s1003_s22, 4  ;;  %vm814_vm2 = vcmask 123904   ;;  %s823_s23 = int_to_ptr.vmem [resolvable:$true] %s822_s23 }
  0x16   :  { %v221_v44 = vld [vmem:[%s1521_s3 + $0x38] sm:$0xff]  ;;  %851 = vmatpush3.msra.mxu0 %v222_v40  ;;  %886 = vmatpush3.msra.mxu1 %v254_v41  ;;  %v220_v48 = vld [vmem:[%s1521_s3 + $0x30] sm:$0xff]  ;;  %v267_v51 = vld [vmem:[%s1521_s3 + $0x1a8] sm:$0xff]  ;;  %v1275_v12 = vshrl.u32 %v44_v11, 7  ;;  %s980_s24 = scalar_lea.vmem %s823_s23, 32  ;;  %p985_p1 = scmp.lt.s32.totalorder %s823_s23, %s823_s23 }
  0x17   :  { %v253_v45 = vld [vmem:[%s1521_s3 + $0x138] sm:$0xff]  ;;  %852 = vmatprep.subr.mxu0 %v237_v42  ;;  %887 = vmatprep.subr.mxu1 %v269_v43  ;;  %v252_v49 = vld [vmem:[%s1521_s3 + $0x130] sm:$0xff]  ;;  %v219_v52 = vld [vmem:[%s1521_s3 + $0x28] sm:$0xff]  ;;  %p981_p0 = scmp.ne.s32.totalorder %s823_s23, %s980_s24  ;;  %p986_p2 = scmp.lt.s32.totalorder %s980_s24, %s980_s24 }
  0x18   :  { %853 = vmatpush3.msra.mxu0 %v221_v44  ;;  %888 = vmatpush3.msra.mxu1 %v253_v45  ;;  %v251_v53 = vld [vmem:[%s1521_s3 + $0x128] sm:$0xff]  ;;  %v234_v54 = vld [vmem:[%s1521_s3 + $0xa0] sm:$0xff]  ;;  %v233_v58 = vld [vmem:[%s1521_s3 + $0x98] sm:$0xff]  ;;  %v54_v13 = vsub.s32 2, %v1275_v12  ;;  %v46_v14 = vsub.s32 0, %v1275_v12  ;;  %v50_v16 = vsub.s32 1, %v1275_v12 }
  0x19   :  { %854 = vmatprep.subr.mxu0 %v236_v46  ;;  %889 = vmatprep.subr.mxu1 %v268_v47  ;;  %v266_v55 = vld [vmem:[%s1521_s3 + $0x1a0] sm:$0xff]  ;;  %v265_v59 = vld [vmem:[%s1521_s3 + $0x198] sm:$0xff]  ;;  %v232_v62 = vld [vmem:[%s1521_s3 + $0x90] sm:$0xff]  ;;  %v58_v17 = vsub.s32 3, %v1275_v12  ;;  %p987_p3 = por %p986_p2, %p985_p1 }
  0x1a   :  { %855 = vmatpush3.msra.mxu0 %v220_v48  ;;  %890 = vmatpush3.msra.mxu1 %v252_v49  ;;  %v218_v56 = vld [vmem:[%s1521_s3 + $0x20] sm:$0xff]  ;;  %v217_v60 = vld [vmem:[%s1521_s3 + $0x18] sm:$0xff]  ;;  %v264_v63 = vld [vmem:[%s1521_s3 + $0x190] sm:$0xff] }
  0x1b   :  { %856 = vmatprep.subr.mxu0 %v235_v50  ;;  %891 = vmatprep.subr.mxu1 %v267_v51  ;;  %v250_v57 = vld [vmem:[%s1521_s3 + $0x120] sm:$0xff]  ;;  %v249_v61 = vld [vmem:[%s1521_s3 + $0x118] sm:$0xff]  ;;  %v216_v0 = vld [vmem:[%s1521_s3 + $0x10] sm:$0xff]  ;;  %p988_p4 = pnand %p987_p3, %p981_p0 }
  0x1c   :  { %857 = vmatpush3.msra.mxu0 %v219_v52  ;;  %892 = vmatpush3.msra.mxu1 %v251_v53  ;;  %v248_v1 = vld [vmem:[%s1521_s3 + $0x110] sm:$0xff]  ;;  %v231_v2 = vld [vmem:[%s1521_s3 + $0x88] sm:$0xff]  ;;  %v230_v6 = vld [vmem:[%s1521_s3 + $0x80] sm:$0xff] }
  0x1d   :  { %858 = vmatprep.subr.mxu0 %v234_v54  ;;  %893 = vmatprep.subr.mxu1 %v266_v55  ;;  %v263_v3 = vld [vmem:[%s1521_s3 + $0x188] sm:$0xff]  ;;  %v262_v7 = vld [vmem:[%s1521_s3 + $0x180] sm:$0xff]  ;;  %v429_v35 = vld [vmem:[%s1523_s5 + $0x18] sm:$0xff] }
  0x1e   :  { %859 = vmatpush3.msra.mxu0 %v218_v56  ;;  %894 = vmatpush3.msra.mxu1 %v250_v57  ;;  %v215_v4 = vld [vmem:[%s1521_s3 + $0x8] sm:$0xff]  ;;  %v214_v8 = vld [vmem:[%s1521_s3] sm:$0xff]  ;;  %v428_v37 = vld [vmem:[%s1523_s5 + $0x10] sm:$0xff] }
  0x1f   :  { %860 = vmatprep.subr.mxu0 %v233_v58  ;;  %895 = vmatprep.subr.mxu1 %v265_v59  ;;  %v247_v5 = vld [vmem:[%s1521_s3 + $0x108] sm:$0xff]  ;;  %v246_v10 = vld [vmem:[%s1521_s3 + $0x100] sm:$0xff]  ;;  %v665_v38 = vld [vmem:[%s1525_s7 + $0x1f8] sm:$0xff] }
  0x20   :  { %861 = vmatpush3.msra.mxu0 %v217_v60  ;;  %896 = vmatpush3.msra.mxu1 %v249_v61  ;;  %v42_v15 = vld [vmem:[%s1520_s2] sm:$0xf]  ;;  %v427_v34 = vld [vmem:[%s1523_s5 + $0x8] sm:$0xff]  ;;  %v617_v49 = vld [vmem:[%s1525_s7 + $0x78] sm:$0xff] }
  0x21   :  { %862 = vmatprep.subr.mxu0 %v232_v62  ;;  %897 = vmatprep.subr.mxu1 %v264_v63  ;;  %v55_v18 = vrot.slane %v42_v15, %v54_v13  ;;  %v47_v19 = vrot.slane %v42_v15, %v46_v14  ;;  %v51_v20 = vrot.slane %v42_v15, %v50_v16  ;;  %v426_v36 = vld [vmem:[%s1523_s5] sm:$0xff]  ;;  %v649_v50 = vld [vmem:[%s1525_s7 + $0x178] sm:$0xff]  ;;  %v632_v51 = vld [vmem:[%s1525_s7 + $0xf0] sm:$0xff] }
  0x22   :  { %863 = vmatpush3.msra.mxu0 %v216_v0  ;;  %898 = vmatpush3.msra.mxu1 %v248_v1  ;;  %v59_v21 = vrot.slane %v42_v15, %v58_v17  ;;  %v832_v41 = vld [vmem:[%s1522_s4] ss:$0 sm:$0xff]  ;;  %v664_v52 = vld [vmem:[%s1525_s7 + $0x1f0] sm:$0xff]  ;;  %v631_v55 = vld [vmem:[%s1525_s7 + $0xe8] sm:$0xff] }
  0x23   :  { %864 = vmatprep.subr.mxu0 %v231_v2  ;;  %899 = vmatprep.subr.mxu1 %v263_v3  ;;  %v616_v53 = vld [vmem:[%s1525_s7 + $0x70] sm:$0xff]  ;;  %v663_v56 = vld [vmem:[%s1525_s7 + $0x1e8] sm:$0xff]  ;;  %v630_v59 = vld [vmem:[%s1525_s7 + $0xe0] sm:$0xff] }
  0x24   :  { %865 = vmatpush3.msra.mxu0 %v215_v4  ;;  %900 = vmatpush3.msra.mxu1 %v247_v5  ;;  %v648_v54 = vld [vmem:[%s1525_s7 + $0x170] sm:$0xff]  ;;  %v615_v57 = vld [vmem:[%s1525_s7 + $0x68] sm:$0xff]  ;;  %v662_v60 = vld [vmem:[%s1525_s7 + $0x1e0] sm:$0xff] }
  0x25   :  { %866 = vmatprep.subr.mxu0 %v230_v6  ;;  %901 = vmatprep.subr.mxu1 %v262_v7  ;;  %v647_v58 = vld [vmem:[%s1525_s7 + $0x168] sm:$0xff]  ;;  %v614_v61 = vld [vmem:[%s1525_s7 + $0x60] sm:$0xff]  ;;  %v629_v63 = vld [vmem:[%s1525_s7 + $0xd8] sm:$0xff] }
  0x26   :  { %867 = vmatpush3.msra.mxu0 %v214_v8  ;;  %902 = vmatpush3.msra.mxu1 %v246_v10  ;;  %v646_v62 = vld [vmem:[%s1525_s7 + $0x160] sm:$0xff]  ;;  %v661_v0 = vld [vmem:[%s1525_s7 + $0x1d8] sm:$0xff]  ;;  %v628_v3 = vld [vmem:[%s1525_s7 + $0xd0] sm:$0xff] }
  0x27   :  { %486 = vmatprep.subr.mxu0 %v427_v34  ;;  %557 = vmatprep.subr.mxu1 %v429_v35  ;;  %v613_v1 = vld [vmem:[%s1525_s7 + $0x58] sm:$0xff]  ;;  %v660_v4 = vld [vmem:[%s1525_s7 + $0x1d0] sm:$0xff]  ;;  %v627_v7 = vld [vmem:[%s1525_s7 + $0xc8] sm:$0xff] }
  0x28   :  { %v645_v2 = vld [vmem:[%s1525_s7 + $0x158] sm:$0xff]  ;;  %v612_v5 = vld [vmem:[%s1525_s7 + $0x50] sm:$0xff]  ;;  %v659_v8 = vld [vmem:[%s1525_s7 + $0x1c8] sm:$0xff] }
  0x29   :  { %v644_v6 = vld [vmem:[%s1525_s7 + $0x150] sm:$0xff]  ;;  %v611_v10 = vld [vmem:[%s1525_s7 + $0x48] sm:$0xff]  ;;  %v626_v15 = vld [vmem:[%s1525_s7 + $0xc0] sm:$0xff] }
  0x2a   :  { %v643_v11 = vld [vmem:[%s1525_s7 + $0x148] sm:$0xff]  ;;  %v654_v34 = vld [vmem:[%s1525_s7 + $0x1a0] sm:$0xff] }
  0x2b   :  { %v606_v35 = vld [vmem:[%s1525_s7 + $0x20] sm:$0xff] }
  0x2c   :  { %v835_v12 = vld [vmem:[%s1526_s8] ss:$0 sm:$0xff] }
  0xc6   :  { %v134_v22 = vpop.f32.mrf.mxu0  ;;  %v205_v23 = vpop.f32.mrf.mxu1 }
  0xc7   :  { %v206_v24 = vadd.f32 %v205_v23, %v55_v18  ;;  %v135_v25 = vadd.f32 %v134_v22, %v47_v19  ;;  %v658_v18 = vld [vmem:[%s1525_s7 + $0x1c0] sm:$0xff]  ;;  %v657_v22 = vld [vmem:[%s1525_s7 + $0x1b8] sm:$0xff] }
  0xc8   :  { %v136_v26 = vpop.f32.mrf.mxu0  ;;  %v207_v27 = vpop.f32.mrf.mxu1  ;;  %v610_v19 = vld [vmem:[%s1525_s7 + $0x40] sm:$0xff]  ;;  %v609_v23 = vld [vmem:[%s1525_s7 + $0x38] sm:$0xff] }
  0xc9   :  { %v137_v28 = vadd.f32 %v136_v26, %v51_v20  ;;  %v208_v29 = vadd.f32 %v207_v27, %v59_v21  ;;  %v212_v30 = vmax.f32 %v206_v24, 0.0  ;;  %v210_v33 = vmax.f32 %v135_v25, 0.0  ;;  %v642_v20 = vld [vmem:[%s1525_s7 + $0x140] sm:$0xff]  ;;  %v625_v21 = vld [vmem:[%s1525_s7 + $0xb8] sm:$0xff]  ;;  %v624_v25 = vld [vmem:[%s1525_s7 + $0xb0] sm:$0xff] }
  0xca   :  { %v641_v24 = vld [vmem:[%s1525_s7 + $0x138] sm:$0xff]  ;;  %v656_v26 = vld [vmem:[%s1525_s7 + $0x1b0] sm:$0xff] }
  0xcb   :  { %v211_v31 = vmax.f32 %v137_v28, 0.0  ;;  %v213_v32 = vmax.f32 %v208_v29, 0.0  ;;  %v608_v27 = vld [vmem:[%s1525_s7 + $0x30] sm:$0xff]  ;;  %v623_v29 = vld [vmem:[%s1525_s7 + $0xa8] sm:$0xff] }
  0xcc   :  { %v640_v28 = vld [vmem:[%s1525_s7 + $0x130] sm:$0xff] }
  0xcd   :  { %349 = vmatprep.mubr.f32.mxu0 %v211_v31  ;;  %419 = vmatprep.mubr.f32.mxu1 %v213_v32  ;;  %v607_v31 = vld [vmem:[%s1525_s7 + $0x28] sm:$0xff] }
  0xce   :  { %350 = vmatmul.mubr.f32.vlgmr.msra.gmra.mxu0 %v210_v33  ;;  %420 = vmatmul.mubr.f32.vlgmr.msra.gmra.mxu1 %v212_v30  ;;  %v655_v30 = vld [vmem:[%s1525_s7 + $0x1a8] sm:$0xff]  ;;  %v622_v33 = vld [vmem:[%s1525_s7 + $0xa0] sm:$0xff] }
  0xcf   :  { %520 = vmatprep.mubr.f32.mxu0 %v1002_v9  ;;  %591 = vmatprep.mubr.f32.mxu1 %v1002_v9  ;;  %v633_v9 = vld [vmem:[%s1525_s7 + $0xf8] sm:$0xff]  ;;  %v639_v32 = vld [vmem:[%s1525_s7 + $0x128] sm:$0xff] }
  0xd0   :  { %487 = vmatpush1.msra.mxu0 %v426_v36  ;;  %558 = vmatpush1.msra.mxu1 %v428_v37  ;;  %v638_v36 = vld [vmem:[%s1525_s7 + $0x120] sm:$0xff]  ;;  %v621_v37 = vld [vmem:[%s1525_s7 + $0x98] sm:$0xff] }
  0xd1   :  { %906 = vmatprep.subr.mxu0 %v633_v9  ;;  %941 = vmatprep.subr.mxu1 %v665_v38  ;;  %v653_v9 = vld [vmem:[%s1525_s7 + $0x198] sm:$0xff] }
  0xd2   :  { %v605_v38 = vld [vmem:[%s1525_s7 + $0x18] sm:$0xff] }
 0x18e   :  { %v868_v39 = vpop.f32.mrf.mxu0  ;;  %v903_v40 = vpop.f32.mrf.mxu1 }
 0x190   :  { %v869_v42 = vpop.f32.mrf.mxu0  ;;  %v904_v43 = vpop.f32.mrf.mxu1 }
 0x191   :  { %v870_v44 = vadd.f32 %v869_v42, %v868_v39  ;;  %v905_v46 = vadd.f32 %v904_v43, %v903_v40  ;;  %v637_v39 = vld [vmem:[%s1525_s7 + $0x118] sm:$0xff]  ;;  %v620_v40 = vld [vmem:[%s1525_s7 + $0x90] sm:$0xff] }
 0x192   :  { %v604_v42 = vld [vmem:[%s1525_s7 + $0x10] sm:$0xff] }
 0x193   :  { %v352_v45 = vadd.f32 %v870_v44, %v832_v41  ;;  %v652_v41 = vld [vmem:[%s1525_s7 + $0x190] sm:$0xff]  ;;  %v619_v44 = vld [vmem:[%s1525_s7 + $0x88] sm:$0xff] }
 0x194   :  { %v636_v43 = vld [vmem:[%s1525_s7 + $0x110] sm:$0xff] }
 0x195   :  { %v422_v47 = vadd.f32 %v905_v46, %v352_v45  ;;  %v651_v45 = vld [vmem:[%s1525_s7 + $0x188] sm:$0xff] }
 0x196   :  { %v603_v46 = vld [vmem:[%s1525_s7 + $0x8] sm:$0xff] }
 0x197   :  { %v425_v48 = vmax.f32 %v422_v47, 0.0  ;;  %v635_v47 = vld [vmem:[%s1525_s7 + $0x108] sm:$0xff] }
 0x199   :  { %833 = vmatmul.mubr.msk.f32.vlgmr.msra.gmra.mxu0 %vm452_vm1, %v425_v48  ;;  %834 = vmatmul.mubr.msk.f32.vlgmr.msra.gmra.mxu1 %vm452_vm1, %v425_v48  ;;  %v618_v48 = vld [vmem:[%s1525_s7 + $0x80] sm:$0xff] }
 0x19a   :  { %907 = vmatpush3.msra.mxu0 %v617_v49  ;;  %942 = vmatpush3.msra.mxu1 %v649_v50  ;;  %v650_v49 = vld [vmem:[%s1525_s7 + $0x180] sm:$0xff] }
 0x19b   :  { %908 = vmatprep.subr.mxu0 %v632_v51  ;;  %943 = vmatprep.subr.mxu1 %v664_v52  ;;  %v602_v50 = vld [vmem:[%s1525_s7] sm:$0xff] }
 0x19c   :  { %909 = vmatpush3.msra.mxu0 %v616_v53  ;;  %944 = vmatpush3.msra.mxu1 %v648_v54  ;;  %v634_v51 = vld [vmem:[%s1525_s7 + $0x100] sm:$0xff] }
 0x19d   :  { %910 = vmatprep.subr.mxu0 %v631_v55  ;;  %945 = vmatprep.subr.mxu1 %v663_v56  ;;  %v430_v52 = vld [vmem:[%s1524_s6] sm:$0xf] }
 0x19e   :  { %911 = vmatpush3.msra.mxu0 %v615_v57  ;;  %946 = vmatpush3.msra.mxu1 %v647_v58  ;;  %v435_v53 = vrot.slane %v430_v52, %v46_v14  ;;  %v443_v54 = vrot.slane %v430_v52, %v54_v13  ;;  %v439_v55 = vrot.slane %v430_v52, %v50_v16 }
 0x19f   :  { %912 = vmatprep.subr.mxu0 %v630_v59  ;;  %947 = vmatprep.subr.mxu1 %v662_v60  ;;  %v447_v56 = vrot.slane %v430_v52, %v58_v17 }
 0x1a0   :  { %913 = vmatpush3.msra.mxu0 %v614_v61  ;;  %948 = vmatpush3.msra.mxu1 %v646_v62 }
 0x1a1   :  { %914 = vmatprep.subr.mxu0 %v629_v63  ;;  %949 = vmatprep.subr.mxu1 %v661_v0 }
 0x1a2   :  { %915 = vmatpush3.msra.mxu0 %v613_v1  ;;  %950 = vmatpush3.msra.mxu1 %v645_v2 }
 0x1a3   :  { %916 = vmatprep.subr.mxu0 %v628_v3  ;;  %951 = vmatprep.subr.mxu1 %v660_v4 }
 0x1a4   :  { %917 = vmatpush3.msra.mxu0 %v612_v5  ;;  %952 = vmatpush3.msra.mxu1 %v644_v6 }
 0x1a5   :  { %918 = vmatprep.subr.mxu0 %v627_v7  ;;  %953 = vmatprep.subr.mxu1 %v659_v8 }
 0x1a6   :  { %919 = vmatpush3.msra.mxu0 %v611_v10  ;;  %954 = vmatpush3.msra.mxu1 %v643_v11 }
 0x1a7   :  { %920 = vmatprep.subr.mxu0 %v626_v15  ;;  %955 = vmatprep.subr.mxu1 %v658_v18 }
 0x1a8   :  { %921 = vmatpush3.msra.mxu0 %v610_v19  ;;  %956 = vmatpush3.msra.mxu1 %v642_v20 }
 0x1a9   :  { %922 = vmatprep.subr.mxu0 %v625_v21  ;;  %957 = vmatprep.subr.mxu1 %v657_v22 }
 0x1aa   :  { %923 = vmatpush3.msra.mxu0 %v609_v23  ;;  %958 = vmatpush3.msra.mxu1 %v641_v24 }
 0x1ab   :  { %924 = vmatprep.subr.mxu0 %v624_v25  ;;  %959 = vmatprep.subr.mxu1 %v656_v26 }
 0x1ac   :  { %925 = vmatpush3.msra.mxu0 %v608_v27  ;;  %960 = vmatpush3.msra.mxu1 %v640_v28 }
 0x1ad   :  { %926 = vmatprep.subr.mxu0 %v623_v29  ;;  %961 = vmatprep.subr.mxu1 %v655_v30 }
 0x1ae   :  { %927 = vmatpush3.msra.mxu0 %v607_v31  ;;  %962 = vmatpush3.msra.mxu1 %v639_v32 }
 0x1af   :  { %928 = vmatprep.subr.mxu0 %v622_v33  ;;  %963 = vmatprep.subr.mxu1 %v654_v34 }
 0x1b0   :  { %929 = vmatpush3.msra.mxu0 %v606_v35  ;;  %964 = vmatpush3.msra.mxu1 %v638_v36 }
 0x1b1   :  { %930 = vmatprep.subr.mxu0 %v621_v37  ;;  %965 = vmatprep.subr.mxu1 %v653_v9 }
 0x1b2   :  { %931 = vmatpush3.msra.mxu0 %v605_v38  ;;  %966 = vmatpush3.msra.mxu1 %v637_v39 }
 0x1b3   :  { %932 = vmatprep.subr.mxu0 %v620_v40  ;;  %967 = vmatprep.subr.mxu1 %v652_v41 }
 0x1b4   :  { %933 = vmatpush3.msra.mxu0 %v604_v42  ;;  %968 = vmatpush3.msra.mxu1 %v636_v43 }
 0x1b5   :  { %934 = vmatprep.subr.mxu0 %v619_v44  ;;  %969 = vmatprep.subr.mxu1 %v651_v45 }
 0x1b6   :  { %935 = vmatpush3.msra.mxu0 %v603_v46  ;;  %970 = vmatpush3.msra.mxu1 %v635_v47 }
 0x1b7   :  { %936 = vmatprep.subr.mxu0 %v618_v48  ;;  %971 = vmatprep.subr.mxu1 %v650_v49 }
 0x1b8   :  { %937 = vmatpush3.msra.mxu0 %v602_v50  ;;  %972 = vmatpush3.msra.mxu1 %v634_v51 }
 0x259   :  { %v522_v57 = vpop.f32.mrf.mxu0  ;;  %v593_v58 = vpop.f32.mrf.mxu1 }
 0x25a   :  { %v523_v59 = vadd.f32 %v522_v57, %v435_v53  ;;  %v594_v60 = vadd.f32 %v593_v58, %v443_v54 }
 0x25b   :  { %v524_v61 = vpop.f32.mrf.mxu0  ;;  %v595_v62 = vpop.f32.mrf.mxu1 }
 0x25c   :  { %v525_v63 = vadd.f32 %v524_v61, %v439_v55  ;;  %v596_v0 = vadd.f32 %v595_v62, %v447_v56  ;;  %v598_v14 = vmax.f32 %v523_v59, 0.0  ;;  %v600_v3 = vmax.f32 %v594_v60, 0.0 }
 0x25e   :  { %v599_v1 = vmax.f32 %v525_v63, 0.0  ;;  %v601_v2 = vmax.f32 %v596_v0, 0.0 }
 0x260   :  { %737 = vmatprep.mubr.f32.mxu0 %v599_v1  ;;  %807 = vmatprep.mubr.f32.mxu1 %v601_v2 }
 0x261   :  { %738 = vmatmul.mubr.f32.vlgmr.msra.gmra.mxu0 %v598_v14  ;;  %808 = vmatmul.mubr.f32.vlgmr.msra.gmra.mxu1 %v600_v3 }
 0x321   :  { %v938_v13 = vpop.f32.mrf.mxu0  ;;  %v973_v16 = vpop.f32.mrf.mxu1 }
 0x323   :  { %v939_v17 = vpop.f32.mrf.mxu0  ;;  %v974_v4 = vpop.f32.mrf.mxu1 }
 0x324   :  { %v940_v5 = vadd.f32 %v939_v17, %v938_v13  ;;  %v975_v7 = vadd.f32 %v974_v4, %v973_v16 }
 0x326   :  { %v740_v6 = vadd.f32 %v940_v5, %v835_v12 }
 0x328   :  { %v810_v8 = vadd.f32 %v975_v7, %v740_v6 }
 0x32a   :  { %978 = vtanh.f32 %v810_v8 }
 0x337   :  { %v979_v10 = vpop.eup %978 }
 0x338   :  { %815 = vst.msk [vmem:[#allocation2] sm:$0x3] %vm814_vm2, %v979_v10 }
 0x339   :  { %991 = shalt.err (!%p988_p4)
}
 0x33a   :  { %825 = dma.vmem_to_hbm [thread:$0]  %s823_s23, 32, %s1527_s9, [#allocation3]  }
 0x33b   :  { %1000 = dma.done.wait [#allocation3], 32  }
 0x33c   :  { %1001 = vsyncadd [#allocation3], 4294967264 }
 0x33d   :  { %829 = vsyncpa [#allocation3], 1 }

</bundles_post_ra>
